<compile_context>
chip_gen: v6e
topology: v6e:2x2x1
jax: 0.10.0
libtpu: 0.0.40
codegen_flags: <defaults>
</compile_context>

<pallas_src>
import functools

import jax
import jax.numpy as jnp
from jax.experimental import pallas as pl
from jax.experimental.pallas import tpu as pltpu


# ---------------------------------------------------------------------------
# Fused kernel
# ---------------------------------------------------------------------------
def _cell_step(inp, c, w, b, mm_dtype, hidden_size):
    """One LSTM cell: single fused gate matmul + gate math (f32)."""
    H = hidden_size
    z = jnp.dot(inp.astype(mm_dtype), w.astype(mm_dtype),
                preferred_element_type=jnp.float32) + b
    # gate order: [forget | input | update | output]
    f_gate = jax.nn.sigmoid(z[:, 0 * H:1 * H])
    i_gate = jax.nn.sigmoid(z[:, 1 * H:2 * H])
    u_gate = jnp.tanh(z[:, 2 * H:3 * H])
    o_gate = jax.nn.sigmoid(z[:, 3 * H:4 * H])
    c_new = c * f_gate + i_gate * u_gate
    h_new = jnp.tanh(c_new) * o_gate
    return h_new, c_new


def _fused_forward_kernel(xh0_ref, c0_ref,          # (B, E+H), (B, H)
                          w0_ref, b0_ref,           # (E+H, 4H), (1, 4H)
                          wr_ref, br_ref,           # (Lr, H, 4H), (Lr, 1, 4H)
                          wo_ref, bo_ref,           # (H, V),  (1, V)
                          out_ref, h_out_ref, c_out_ref,
                          *, n_rest, mm_dtype):
    H = c0_ref.shape[1]

    # Layer 0: pre-concatenated [x, h0] against the combined weight.
    h, c = _cell_step(xh0_ref[...], c0_ref[...], w0_ref[...], b0_ref[...],
                      mm_dtype, H)

    # Layers 1..L-1.  In the PyTorch module the cell input for these layers IS
    # the hidden state, so concat([h, h]) @ [[Wx];[Wh]] == h @ (Wx + Wh) and
    # wr is the pre-folded (H, 4H) weight.  n_rest is static -> unrolled loop.
    for layer in range(n_rest):
        h, c = _cell_step(h, c, wr_ref[layer], br_ref[layer], mm_dtype, H)

    # Output projection fused with a numerically-stable LogSoftmax(dim=1).
    logits = jnp.dot(h.astype(mm_dtype), wo_ref[...].astype(mm_dtype),
                     preferred_element_type=jnp.float32) + bo_ref[...]
    m = jnp.max(logits, axis=1, keepdims=True)
    shifted = logits - m
    lse = jnp.log(jnp.sum(jnp.exp(shifted), axis=1, keepdims=True))
    out_ref[...] = shifted - lse
    h_out_ref[...] = h
    c_out_ref[...] = c


# ---------------------------------------------------------------------------
# pallas_call wrapper (whole forward = one kernel launch)
# ---------------------------------------------------------------------------
_VMEM = pl.BlockSpec(memory_space=pltpu.MemorySpace.VMEM)


@functools.partial(jax.jit, static_argnames=("n_layers", "mm_dtype"))
def language_model_forward(params, x, state, *, n_layers,
                           mm_dtype=jnp.float32):
    # TODO(synk): nn.Dropout is treated as identity (inference / p = 0.0).
    hidden, cell = state
    B, H = hidden.shape
    V = params["wo"].shape[1]

    # Single gate matmul per cell: feed the kernel xh0 = [x | h0].
    xh0 = jnp.concatenate([x, hidden], axis=1)

    kernel = functools.partial(_fused_forward_kernel,
                               n_rest=n_layers - 1, mm_dtype=mm_dtype)
    out, h_out, c_out = pl.pallas_call(
        kernel,
        out_shape=(jax.ShapeDtypeStruct((B, V), jnp.float32),
                   jax.ShapeDtypeStruct((B, H), jnp.float32),
                   jax.ShapeDtypeStruct((B, H), jnp.float32)),
        in_specs=[_VMEM] * 8,
        out_specs=(_VMEM, _VMEM, _VMEM),
    )(xh0, cell,
      params["w0"], params["b0"],
      params["wr"], params["br"],
      params["wo"], params["bo"])
    return out, (h_out, c_out)


# ---------------------------------------------------------------------------
# Parameter construction (deterministic, PyTorch-Linear-style uniform init)
# ---------------------------------------------------------------------------
def _linear_params(key, in_features, out_features):
    bound = 1.0 / float(in_features) ** 0.5
    kw, kb = jax.random.split(key)
    # stored transposed: (in_features, out_features)
    w = jax.random.uniform(kw, (in_features, out_features), jnp.float32,
                           -bound, bound)
    b = jax.random.uniform(kb, (1, out_features), jnp.float32, -bound, bound)
    return w, b


def init_language_model_params(key, input_size, hidden_size, n_layers):
    E, H = input_size, hidden_size

    def make_cell(layer_key, embed):
        keys = jax.random.split(layer_key, 4)
        # gate order matches the kernel: forget, input, update, output
        ws, bs = zip(*[_linear_params(k, embed + H, H) for k in keys])
        return jnp.concatenate(ws, axis=1), jnp.concatenate(bs, axis=1)

    w0, b0 = make_cell(jax.random.fold_in(key, 0), E)        # (E+H, 4H)

    wr_list, br_list = [], []
    for layer in range(1, n_layers):
        w, b = make_cell(jax.random.fold_in(key, layer), H)  # (2H, 4H)
        # input == hidden for layers > 0  =>  fold the two halves together
        wr_list.append(w[:H, :] + w[H:, :])                  # (H, 4H)
        br_list.append(b)
    if wr_list:
        wr = jnp.stack(wr_list)                              # (L-1, H, 4H)
        br = jnp.stack(br_list)                              # (L-1, 1, 4H)
    else:  # n_layers == 1: dummy (unused) rest-layer weights
        wr = jnp.zeros((1, H, 4 * H), jnp.float32)
        br = jnp.zeros((1, 1, 4 * H), jnp.float32)

    wo, bo = _linear_params(jax.random.fold_in(key, 10_000), H, E)
    return {"w0": w0, "b0": b0, "wr": wr, "br": br, "wo": wo, "bo": bo}


# ---------------------------------------------------------------------------
# Pure-JAX reference (PyTorch semantics) for validation
# ---------------------------------------------------------------------------
def _reference_forward(params, x, state, *, n_layers, mm_dtype=jnp.float32):
    hidden, cell = state
    H = hidden.shape[1]

    def step(inp, c, w, b):
        z = jnp.dot(inp.astype(mm_dtype), w.astype(mm_dtype),
                    preferred_element_type=jnp.float32) + b
        f = jax.nn.sigmoid(z[:, :H])
        i = jax.nn.sigmoid(z[:, H:2 * H])
        u = jnp.tanh(z[:, 2 * H:3 * H])
        o = jax.nn.sigmoid(z[:, 3 * H:])
        c_new = c * f + i * u
        return jnp.tanh(c_new) * o, c_new

    hidden, cell = step(jnp.concatenate([x, hidden], axis=1), cell,
                        params["w0"], params["b0"])
    for layer in range(n_layers - 1):
        # input == hidden (single threaded state), pre-folded weight
        hidden, cell = step(hidden, cell, params["wr"][layer],
                            params["br"][layer])
    logits = jnp.dot(hidden.astype(mm_dtype), params["wo"].astype(mm_dtype),
                     preferred_element_type=jnp.float32) + params["bo"]
    return jax.nn.log_softmax(logits, axis=1), (hidden, cell)


# ---------------------------------------------------------------------------
if __name__ == "__main__":
    batch = 2
    input_size = 32      # vocab / embedding size
    hidden_size = 32
    n_layers = 2

    key = jax.random.PRNGKey(0)
    k_params, k_x = jax.random.split(key)

    params = init_language_model_params(k_params, input_size, hidden_size,
                                        n_layers)
    x = jax.random.normal(k_x, (batch, input_size), jnp.float32)
    state0 = (jnp.zeros((batch, hidden_size), jnp.float32),
              jnp.zeros((batch, hidden_size), jnp.float32))

    # ---- f32 path (faithful to the PyTorch module's dtype): tight check ----
    logp, (h_out, c_out) = language_model_forward(params, x, state0,
                                                  n_layers=n_layers)
    jax.block_until_ready((logp, h_out, c_out))

    ref_logp, (ref_h, ref_c) = _reference_forward(params, x, state0,
                                                  n_layers=n_layers)
    assert jnp.allclose(logp, ref_logp, atol=1e-5, rtol=1e-5)
    assert jnp.allclose(h_out, ref_h, atol=1e-5, rtol=1e-5)
    assert jnp.allclose(c_out, ref_c, atol=1e-5, rtol=1e-5)

    # ---- bf16 matmul operands (v6e/v7x fast path; gate math stays f32) ----
    logp_bf, (h_bf, c_bf) = language_model_forward(
        params, x, state0, n_layers=n_layers, mm_dtype=jnp.bfloat16)
    jax.block_until_ready((logp_bf, h_bf, c_bf))

    ref_bf, (rh_bf, rc_bf) = _reference_forward(
        params, x, state0, n_layers=n_layers, mm_dtype=jnp.bfloat16)
    assert jnp.allclose(logp_bf, ref_bf, atol=2e-3, rtol=2e-3)
    assert jnp.allclose(h_bf, rh_bf, atol=2e-3, rtol=2e-3)
    assert jnp.allclose(c_bf, rc_bf, atol=2e-3, rtol=2e-3)

    print("KERNEL_OK")
</pallas_src>

<mosaic_0001>
module attributes {stable_mosaic.version = 11 : i64} {
  func.func @_fused_forward_kernel(%arg0: memref<2x64xf32, #tpu.memory_space<vmem>>, %arg1: memref<2x32xf32, #tpu.memory_space<vmem>>, %arg2: memref<64x128xf32, #tpu.memory_space<vmem>>, %arg3: memref<1x128xf32, #tpu.memory_space<vmem>>, %arg4: memref<1x32x128xf32, #tpu.memory_space<vmem>>, %arg5: memref<1x1x128xf32, #tpu.memory_space<vmem>>, %arg6: memref<32x32xf32, #tpu.memory_space<vmem>>, %arg7: memref<1x32xf32, #tpu.memory_space<vmem>>, %arg8: memref<2x32xf32, #tpu.memory_space<vmem>>, %arg9: memref<2x32xf32, #tpu.memory_space<vmem>>, %arg10: memref<2x32xf32, #tpu.memory_space<vmem>>) attributes {dimension_semantics = [], scalar_prefetch = 0 : i64, scratch_operands = 0 : i64, tpu.core_type = #tpu.core_type<tc>} {
    %c0 = arith.constant 0 : index
    %c0_0 = arith.constant 0 : index
    %0 = vector.load %arg0[%c0, %c0_0] : memref<2x64xf32, #tpu.memory_space<vmem>>, vector<2x64xf32>
    %c0_1 = arith.constant 0 : index
    %c0_2 = arith.constant 0 : index
    %1 = vector.load %arg1[%c0_1, %c0_2] : memref<2x32xf32, #tpu.memory_space<vmem>>, vector<2x32xf32>
    %c0_3 = arith.constant 0 : index
    %c0_4 = arith.constant 0 : index
    %2 = vector.load %arg2[%c0_3, %c0_4] : memref<64x128xf32, #tpu.memory_space<vmem>>, vector<64x128xf32>
    %c0_5 = arith.constant 0 : index
    %c0_6 = arith.constant 0 : index
    %3 = vector.load %arg3[%c0_5, %c0_6] : memref<1x128xf32, #tpu.memory_space<vmem>>, vector<1x128xf32>
    %cst = arith.constant dense<0.000000e+00> : vector<2x128xf32>
    %4 = tpu.matmul %0, %2, %cst {dimension_numbers = #tpu.dot_dimension_numbers<[1], [0], [0], [1], [0, 0, 1, 1], [], []>} : vector<2x64xf32>, vector<64x128xf32>, vector<2x128xf32> -> vector<2x128xf32>
    %5 = vector.broadcast %3 : vector<1x128xf32> to vector<2x128xf32>
    %6 = arith.addf %4, %5 : vector<2x128xf32>
    %7 = vector.extract_strided_slice %6 {offsets = [0, 0], sizes = [2, 32], strides = [1, 1]} : vector<2x128xf32> to vector<2x32xf32>
    %8 = arith.negf %7 : vector<2x32xf32>
    %9 = math.exp %8 : vector<2x32xf32>
    %cst_7 = arith.constant 1.000000e+00 : f32
    %10 = vector.broadcast %cst_7 : f32 to vector<2x32xf32>
    %11 = arith.addf %10, %9 : vector<2x32xf32>
    %12 = arith.divf %10, %11 : vector<2x32xf32>
    %13 = vector.extract_strided_slice %6 {offsets = [0, 32], sizes = [2, 32], strides = [1, 1]} : vector<2x128xf32> to vector<2x32xf32>
    %14 = arith.negf %13 : vector<2x32xf32>
    %15 = math.exp %14 : vector<2x32xf32>
    %cst_8 = arith.constant 1.000000e+00 : f32
    %16 = vector.broadcast %cst_8 : f32 to vector<2x32xf32>
    %17 = arith.addf %16, %15 : vector<2x32xf32>
    %18 = arith.divf %16, %17 : vector<2x32xf32>
    %19 = vector.extract_strided_slice %6 {offsets = [0, 64], sizes = [2, 32], strides = [1, 1]} : vector<2x128xf32> to vector<2x32xf32>
    %20 = math.tanh %19 : vector<2x32xf32>
    %21 = vector.extract_strided_slice %6 {offsets = [0, 96], sizes = [2, 32], strides = [1, 1]} : vector<2x128xf32> to vector<2x32xf32>
    %22 = arith.negf %21 : vector<2x32xf32>
    %23 = math.exp %22 : vector<2x32xf32>
    %cst_9 = arith.constant 1.000000e+00 : f32
    %24 = vector.broadcast %cst_9 : f32 to vector<2x32xf32>
    %25 = arith.addf %24, %23 : vector<2x32xf32>
    %26 = arith.divf %24, %25 : vector<2x32xf32>
    %27 = arith.mulf %1, %12 : vector<2x32xf32>
    %28 = arith.mulf %18, %20 : vector<2x32xf32>
    %29 = arith.addf %27, %28 : vector<2x32xf32>
    %30 = math.tanh %29 : vector<2x32xf32>
    %31 = arith.mulf %30, %26 : vector<2x32xf32>
    %c0_10 = arith.constant 0 : index
    %c0_11 = arith.constant 0 : index
    %c0_12 = arith.constant 0 : index
    %32 = vector.load %arg4[%c0_10, %c0_11, %c0_12] : memref<1x32x128xf32, #tpu.memory_space<vmem>>, vector<1x32x128xf32>
    %33 = vector.shape_cast %32 : vector<1x32x128xf32> to vector<32x128xf32>
    %c0_13 = arith.constant 0 : index
    %c0_14 = arith.constant 0 : index
    %c0_15 = arith.constant 0 : index
    %34 = vector.load %arg5[%c0_13, %c0_14, %c0_15] : memref<1x1x128xf32, #tpu.memory_space<vmem>>, vector<1x1x128xf32>
    %35 = vector.shape_cast %34 : vector<1x1x128xf32> to vector<1x128xf32>
    %cst_16 = arith.constant dense<0.000000e+00> : vector<2x128xf32>
    %36 = tpu.matmul %31, %33, %cst_16 {dimension_numbers = #tpu.dot_dimension_numbers<[1], [0], [0], [1], [0, 0, 1, 1], [], []>} : vector<2x32xf32>, vector<32x128xf32>, vector<2x128xf32> -> vector<2x128xf32>
    %37 = vector.broadcast %35 : vector<1x128xf32> to vector<2x128xf32>
    %38 = arith.addf %36, %37 : vector<2x128xf32>
    %39 = vector.extract_strided_slice %38 {offsets = [0, 0], sizes = [2, 32], strides = [1, 1]} : vector<2x128xf32> to vector<2x32xf32>
    %40 = arith.negf %39 : vector<2x32xf32>
    %41 = math.exp %40 : vector<2x32xf32>
    %cst_17 = arith.constant 1.000000e+00 : f32
    %42 = vector.broadcast %cst_17 : f32 to vector<2x32xf32>
    %43 = arith.addf %42, %41 : vector<2x32xf32>
    %44 = arith.divf %42, %43 : vector<2x32xf32>
    %45 = vector.extract_strided_slice %38 {offsets = [0, 32], sizes = [2, 32], strides = [1, 1]} : vector<2x128xf32> to vector<2x32xf32>
    %46 = arith.negf %45 : vector<2x32xf32>
    %47 = math.exp %46 : vector<2x32xf32>
    %cst_18 = arith.constant 1.000000e+00 : f32
    %48 = vector.broadcast %cst_18 : f32 to vector<2x32xf32>
    %49 = arith.addf %48, %47 : vector<2x32xf32>
    %50 = arith.divf %48, %49 : vector<2x32xf32>
    %51 = vector.extract_strided_slice %38 {offsets = [0, 64], sizes = [2, 32], strides = [1, 1]} : vector<2x128xf32> to vector<2x32xf32>
    %52 = math.tanh %51 : vector<2x32xf32>
    %53 = vector.extract_strided_slice %38 {offsets = [0, 96], sizes = [2, 32], strides = [1, 1]} : vector<2x128xf32> to vector<2x32xf32>
    %54 = arith.negf %53 : vector<2x32xf32>
    %55 = math.exp %54 : vector<2x32xf32>
    %cst_19 = arith.constant 1.000000e+00 : f32
    %56 = vector.broadcast %cst_19 : f32 to vector<2x32xf32>
    %57 = arith.addf %56, %55 : vector<2x32xf32>
    %58 = arith.divf %56, %57 : vector<2x32xf32>
    %59 = arith.mulf %29, %44 : vector<2x32xf32>
    %60 = arith.mulf %50, %52 : vector<2x32xf32>
    %61 = arith.addf %59, %60 : vector<2x32xf32>
    %62 = math.tanh %61 : vector<2x32xf32>
    %63 = arith.mulf %62, %58 : vector<2x32xf32>
    %c0_20 = arith.constant 0 : index
    %c0_21 = arith.constant 0 : index
    %64 = vector.load %arg6[%c0_20, %c0_21] : memref<32x32xf32, #tpu.memory_space<vmem>>, vector<32x32xf32>
    %cst_22 = arith.constant dense<0.000000e+00> : vector<2x32xf32>
    %65 = tpu.matmul %63, %64, %cst_22 {dimension_numbers = #tpu.dot_dimension_numbers<[1], [0], [0], [1], [0, 0, 1, 1], [], []>} : vector<2x32xf32>, vector<32x32xf32>, vector<2x32xf32> -> vector<2x32xf32>
    %c0_23 = arith.constant 0 : index
    %c0_24 = arith.constant 0 : index
    %66 = vector.load %arg7[%c0_23, %c0_24] : memref<1x32xf32, #tpu.memory_space<vmem>>, vector<1x32xf32>
    %67 = vector.broadcast %66 : vector<1x32xf32> to vector<2x32xf32>
    %68 = arith.addf %65, %67 : vector<2x32xf32>
    %cst_25 = arith.constant dense<0xFF800000> : vector<2xf32>
    %69 = vector.multi_reduction <maximumf>, %68, %cst_25 [1] : vector<2x32xf32> to vector<2xf32>
    %70 = vector.shape_cast %69 : vector<2xf32> to vector<2x1xf32>
    %71 = vector.broadcast %70 : vector<2x1xf32> to vector<2x32xf32>
    %72 = arith.subf %68, %71 : vector<2x32xf32>
    %73 = math.exp %72 : vector<2x32xf32>
    %cst_26 = arith.constant dense<0.000000e+00> : vector<2xf32>
    %74 = vector.multi_reduction <add>, %73, %cst_26 [1] : vector<2x32xf32> to vector<2xf32>
    %75 = vector.shape_cast %74 : vector<2xf32> to vector<2x1xf32>
    %76 = math.log %75 : vector<2x1xf32>
    %77 = vector.broadcast %76 : vector<2x1xf32> to vector<2x32xf32>
    %78 = arith.subf %72, %77 : vector<2x32xf32>
    %c0_27 = arith.constant 0 : index
    %c0_28 = arith.constant 0 : index
    %79 = vector.load %arg8[%c0_27, %c0_28] : memref<2x32xf32, #tpu.memory_space<vmem>>, vector<2x32xf32>
    tpu.vector_store %arg8[%c0_27, %c0_28], %78 {strides = array<i32>} : memref<2x32xf32, #tpu.memory_space<vmem>>, vector<2x32xf32>,
    %c0_29 = arith.constant 0 : index
    %c0_30 = arith.constant 0 : index
    %80 = vector.load %arg9[%c0_29, %c0_30] : memref<2x32xf32, #tpu.memory_space<vmem>>, vector<2x32xf32>
    tpu.vector_store %arg9[%c0_29, %c0_30], %63 {strides = array<i32>} : memref<2x32xf32, #tpu.memory_space<vmem>>, vector<2x32xf32>,
    %c0_31 = arith.constant 0 : index
    %c0_32 = arith.constant 0 : index
    %81 = vector.load %arg10[%c0_31, %c0_32] : memref<2x32xf32, #tpu.memory_space<vmem>>, vector<2x32xf32>
    tpu.vector_store %arg10[%c0_31, %c0_32], %61 {strides = array<i32>} : memref<2x32xf32, #tpu.memory_space<vmem>>, vector<2x32xf32>,
    return
  }
}

</mosaic_0001>

<bundles_post_ra>
// kernel: language_model_forward.1
= control target key start
LH: loop header
LB: loop body
LE: loop exit
PB: predicated region body
PF: predicated region fallthrough
CT: control target
= control target key end

     0   :  { %16 = vsyncpa [#allocation3], 0  ;;  %s805_s0 = inlined_call_operand.vmem [shape: f32[2,64], index: 0, kind: input, shape index: {}]   ;;  %s806_s1 = inlined_call_operand.vmem [shape: f32[2,32], index: 1, kind: input, shape index: {}]   ;;  %s807_s2 = inlined_call_operand.hbm [shape: f32[64,128], index: 2, kind: input, shape index: {}]   ;;  %s808_s3 = inlined_call_operand.vmem [shape: f32[1,128], index: 3, kind: input, shape index: {}]   ;;  %s809_s4 = inlined_call_operand.hbm [shape: f32[1,32,128], index: 4, kind: input, shape index: {}]   ;;  %s810_s5 = inlined_call_operand.vmem [shape: f32[1,1,128], index: 5, kind: input, shape index: {}]   ;;  %s811_s6 = inlined_call_operand.hbm [shape: f32[32,32], index: 6, kind: input, shape index: {}]   ;;  %s812_s7 = inlined_call_operand.vmem [shape: f32[1,32], index: 7, kind: input, shape index: {}]   ;;  %s813_s8 = inlined_call_operand.hbm [shape: f32[2,32], index: 8, kind: output, shape index: {0}]   ;;  %s814_s9 = inlined_call_operand.hbm [shape: f32[2,32], index: 9, kind: output, shape index: {1}]   ;;  %s815_s10 = inlined_call_operand.hbm [shape: f32[2,32], index: 10, kind: output, shape index: {2}]  }
   0x1   :  { %17 = vsyncpa [#allocation6], 0 }
   0x2   :  { %18 = vsyncpa [#allocation4], 0 }
   0x3   :  { %19 = vsyncpa [#allocation10], 0  ;;  %s670_s13 = smov [#allocation5]   ;;  %s671_s15 = smov [#allocation2]  }
   0x4   :  { %s43_s14 = sshll.u32 %s670_s13, 4  ;;  %s29_s16 = sshll.u32 %s671_s15, 4  ;;  %s44_s14 = int_to_ptr.vmem [resolvable:$true] %s43_s14  ;;  %s30_s16 = int_to_ptr.vmem [resolvable:$true] %s29_s16 }
   0x5   :  { %s550_s17 = scalar_lea.vmem %s44_s14, 512  ;;  %p555_p1 = scmp.lt.s32.totalorder %s44_s14, %s44_s14 }
   0x6   :  { %p551_p0 = scmp.ne.s32.totalorder %s44_s14, %s550_s17  ;;  %p556_p2 = scmp.lt.s32.totalorder %s550_s17, %s550_s17 }
   0x8   :  { %p557_p3 = por %p556_p2, %p555_p1 }
   0xa   :  { %p558_p4 = pnand %p557_p3, %p551_p0 }
   0xc   :  { %561 = shalt.err (!%p558_p4)
}
   0xd   :  { %s672_s18 = smov 128   ;;  %s673_s19 = smov 8  }
   0xe   :  { %49 = dma.hbm_to_vmem [thread:$0]  %s809_s4, 512, %s44_s14, [#allocation6], %s672_s18, %s672_s18, %s673_s19  }
   0xf   :  { %s570_s22 = scalar_lea.vmem %s30_s16, 1024  ;;  %p575_p6 = scmp.lt.s32.totalorder %s30_s16, %s30_s16 }
  0x10   :  { %p571_p5 = scmp.ne.s32.totalorder %s30_s16, %s570_s22  ;;  %p576_p7 = scmp.lt.s32.totalorder %s570_s22, %s570_s22 }
  0x12   :  { %p577_p8 = por %p576_p7, %p575_p6 }
  0x14   :  { %p578_p9 = pnand %p577_p8, %p571_p5 }
  0x16   :  { %581 = shalt.err (!%p578_p9)
}
  0x17   :  { %35 = dma.hbm_to_vmem [thread:$0]  %s807_s2, 1024, %s30_s16, [#allocation3], %s672_s18, %s672_s18, %s673_s19  }
  0x18   :  { %s674_s25 = smov [#allocation7]  }
  0x19   :  { %s57_s26 = sshll.u32 %s674_s25, 4  ;;  %s58_s26 = int_to_ptr.vmem [resolvable:$true] %s57_s26 }
  0x1a   :  { %s590_s27 = scalar_lea.vmem %s58_s26, 512  ;;  %p595_p11 = scmp.lt.s32.totalorder %s58_s26, %s58_s26 }
  0x1b   :  { %p591_p10 = scmp.ne.s32.totalorder %s58_s26, %s590_s27  ;;  %p596_p12 = scmp.lt.s32.totalorder %s590_s27, %s590_s27 }
  0x1d   :  { %p597_p13 = por %p596_p12, %p595_p11 }
  0x1f   :  { %p598_p0 = pnand %p597_p13, %p591_p10 }
  0x21   :  { %601 = shalt.err (!%p598_p0)
}
  0x22   :  { %63 = dma.hbm_to_vmem [thread:$0]  %s811_s6, 512, %s58_s26, [#allocation6], %s672_s18, %s672_s18, %s673_s19  }
  0x23   :  { %662 = dma.done.wait [#allocation3], 1024  }
  0x24   :  { %663 = vsyncadd [#allocation3], 4294966272 }
  0x25   :  { %664 = dma.done.wait [#allocation6], 1024  }
  0x26   :  { %665 = vsyncadd [#allocation6], 4294966272  ;;  %v675_v0 = vmov 0.0   ;;  %vm676_vm0 = vmmov 0   ;;  %v84_v1 = vld [vmem:[#allocation2 + $0x38] sm:$0xff]  ;;  %v83_v2 = vld [vmem:[#allocation2 + $0x30] sm:$0xff] }
  0x27   :  { %469 = vmatprep.subr.mxu0 %v675_v0  ;;  %485 = vmatprep.mubr.msk.f32.mxu0 %vm676_vm0, %v675_v0  ;;  %v82_v3 = vld [vmem:[#allocation2 + $0x28] sm:$0xff]  ;;  %v81_v4 = vld [vmem:[#allocation2 + $0x20] sm:$0xff]  ;;  %v80_v5 = vld [vmem:[#allocation2 + $0x18] sm:$0xff]  ;;  %vm92_vm1 = vcmask 523264   ;;  %s677_s11 = smov 96   ;;  %vm201_vm2 = vcmask 261120  }
  0x28   :  { %488 = vmatprep.subr.mxu1 %v675_v0  ;;  %496 = vmatprep.mubr.msk.f32.mxu1 %vm676_vm0, %v675_v0  ;;  %v79_v6 = vld [vmem:[#allocation2 + $0x10] sm:$0xff]  ;;  %v78_v7 = vld [vmem:[#allocation2 + $0x8] sm:$0xff]  ;;  %v77_v8 = vld [vmem:[#allocation2] sm:$0xff]  ;;  %vm383_vm3 = vcmask 254976   ;;  %s679_s15 = smov [#allocation9]  }
  0x29   :  { %470 = vmatpush3.msra.mxu0 %v84_v1  ;;  %v75_v9 = vld [vmem:[%s805_s0] sm:$0x3]  ;;  %s678_s0 = smov 32   ;;  %v193_v19 = vld [vmem:[#allocation5 + $0x18] sm:$0xff]  ;;  %v192_v20 = vld [vmem:[#allocation5 + $0x10] sm:$0xff]  ;;  %s415_s16 = sshll.u32 %s679_s15, 4  ;;  %s416_s16 = int_to_ptr.vmem [resolvable:$true] %s415_s16 }
  0x2a   :  { %471 = vmatprep.subr.mxu0 %v675_v0  ;;  %v442_v10 = vld [vmem:[%s808_s3] ss:$0 sm:$0xff]  ;;  %489 = vmatpush3.msra.mxu1 %v193_v19  ;;  %v191_v21 = vld [vmem:[#allocation5 + $0x8] sm:$0xff]  ;;  %v302_v41 = vld [vmem:[#allocation7 + $0x18] sm:$0xff]  ;;  %s602_s17 = scalar_lea.vmem %s416_s16, 32  ;;  %p607_p2 = scmp.lt.s32.totalorder %s416_s16, %s416_s16 }
  0x2b   :  { %472 = vmatpush3.msra.mxu0 %v83_v2  ;;  %490 = vmatprep.subr.mxu1 %v675_v0  ;;  %v190_v22 = vld [vmem:[#allocation5] sm:$0xff]  ;;  %v301_v42 = vld [vmem:[#allocation7 + $0x10] sm:$0xff]  ;;  %v300_v43 = vld [vmem:[#allocation7 + $0x8] sm:$0xff]  ;;  %p603_p1 = scmp.ne.s32.totalorder %s416_s16, %s602_s17  ;;  %p608_p3 = scmp.lt.s32.totalorder %s602_s17, %s602_s17 }
  0x2c   :  { %473 = vmatprep.subr.mxu0 %v675_v0  ;;  %491 = vmatpush3.msra.mxu1 %v192_v20  ;;  %v76_v25 = vld [vmem:[%s806_s1] sm:$0x3] }
  0x2d   :  { %474 = vmatpush3.msra.mxu0 %v82_v3  ;;  %492 = vmatprep.subr.mxu1 %v675_v0  ;;  %v445_v32 = vld [vmem:[%s810_s5] ss:$0 sm:$0xff]  ;;  %p609_p4 = por %p608_p3, %p607_p2 }
  0x2e   :  { %475 = vmatprep.subr.mxu0 %v675_v0  ;;  %493 = vmatpush3.msra.mxu1 %v191_v21  ;;  %v299_v44 = vld [vmem:[#allocation7] sm:$0xff] }
  0x2f   :  { %476 = vmatpush3.msra.mxu0 %v81_v4  ;;  %494 = vmatprep.subr.mxu1 %v675_v0  ;;  %v448_v53 = vld [vmem:[%s812_s7] ss:$0 sm:$0xff]  ;;  %p610_p5 = pnand %p609_p4, %p603_p1 }
  0x30   :  { %477 = vmatprep.subr.mxu0 %v675_v0  ;;  %495 = vmatpush3.msra.mxu1 %v190_v22 }
  0x31   :  { %478 = vmatpush3.msra.mxu0 %v80_v5  ;;  %499 = vmatprep.subr.mxu1 %v675_v0 }
  0x32   :  { %479 = vmatprep.subr.mxu0 %v675_v0 }
  0x33   :  { %480 = vmatpush3.msra.mxu0 %v79_v6 }
  0x34   :  { %481 = vmatprep.subr.mxu0 %v675_v0 }
  0x35   :  { %482 = vmatpush3.msra.mxu0 %v78_v7 }
  0x36   :  { %483 = vmatprep.subr.mxu0 %v675_v0 }
  0x37   :  { %484 = vmatpush3.msra.mxu0 %v77_v8 }
  0x38   :  { %486 = vmatmul.mubr.msk.f32.vlgmr.msra.gmra.mxu0 %vm92_vm1, %v75_v9 }
  0xf8   :  { %v162_v11 = vpop.f32.mrf.mxu0 }
  0xf9   :  { %v163_v12 = vadd.f32 %v442_v10, %v162_v11 }
  0xfa   :  { %v487_v13 = vpop.f32.mrf.mxu0 }
  0xfb   :  { %v444_v14 = vmul.f32 -1.442695, %v163_v12  ;;  %522 = vtanh.f32 %v163_v12 }
  0xfd   :  { %524 = vpow2.f32 %v444_v14 }
 0x108   :  { %v523_v15 = vpop.eup %522 }
 0x109   :  { %175 = vrot.lane.b32.xlu0 %v523_v15, %s677_s11 }
 0x10a   :  { %v525_v16 = vpop.eup %524 }
 0x10b   :  { %v169_v17 = vadd.f32 1.0, %v525_v16 }
 0x10d   :  { %526 = vrcp.f32 %v169_v17 }
 0x11a   :  { %v527_v18 = vpop.eup %526 }
 0x11b   :  { %186 = vrot.lane.b32.xlu1 %v527_v18, %s678_s0  ;;  %v173_v26 = vmul.f32 %v527_v18, %v76_v25 }
 0x17b   :  { %v176_v23 = vpop.permute.xlu0 %175 }
 0x17c   :  { %v178_v24 = vmul.f32 %v527_v18, %v176_v23 }
 0x17e   :  { %180 = vrot.lane.b32.xlu0 %v178_v24, %s677_s11 }
 0x18d   :  { %v187_v30 = vpop.permute.xlu1 %186 }
 0x1f0   :  { %v181_v27 = vpop.permute.xlu0 %180 }
 0x1f1   :  { %v183_v28 = vadd.f32 %v181_v27, %v173_v26 }
 0x1f3   :  { %528 = vtanh.f32 %v183_v28 }
 0x200   :  { %v529_v29 = vpop.eup %528 }
 0x201   :  { %v189_v31 = vmul.f32 %v529_v29, %v187_v30 }
 0x203   :  { %497 = vmatmul.mubr.msk.f32.vlgmr.msra.gmra.mxu1 %vm201_vm2, %v189_v31 }
 0x204   :  { %507 = vmatprep.mubr.msk.f32.mxu1 %vm676_vm0, %v675_v0  ;;  %500 = vmatpush3.msra.mxu1 %v302_v41 }
 0x205   :  { %501 = vmatprep.subr.mxu1 %v675_v0 }
 0x206   :  { %502 = vmatpush3.msra.mxu1 %v301_v42 }
 0x207   :  { %503 = vmatprep.subr.mxu1 %v675_v0 }
 0x208   :  { %504 = vmatpush3.msra.mxu1 %v300_v43 }
 0x209   :  { %505 = vmatprep.subr.mxu1 %v675_v0 }
 0x20a   :  { %506 = vmatpush3.msra.mxu1 %v299_v44 }
 0x2c3   :  { %v271_v33 = vpop.f32.mrf.mxu1 }
 0x2c4   :  { %v272_v34 = vadd.f32 %v445_v32, %v271_v33 }
 0x2c5   :  { %v498_v35 = vpop.f32.mrf.mxu1 }
 0x2c6   :  { %v447_v36 = vmul.f32 -1.442695, %v272_v34  ;;  %530 = vtanh.f32 %v272_v34 }
 0x2c8   :  { %532 = vpow2.f32 %v447_v36 }
 0x2d3   :  { %v531_v37 = vpop.eup %530 }
 0x2d4   :  { %284 = vrot.lane.b32.xlu1 %v531_v37, %s677_s11 }
 0x2d5   :  { %v533_v38 = vpop.eup %532 }
 0x2d6   :  { %v278_v39 = vadd.f32 1.0, %v533_v38 }
 0x2d8   :  { %534 = vrcp.f32 %v278_v39 }
 0x2e5   :  { %v535_v40 = vpop.eup %534 }
 0x2e6   :  { %295 = vrot.lane.b32.xlu1 %v535_v40, %s678_s0  ;;  %v282_v47 = vmul.f32 %v535_v40, %v183_v28 }
 0x346   :  { %v285_v45 = vpop.permute.xlu1 %284 }
 0x347   :  { %v287_v46 = vmul.f32 %v535_v40, %v285_v45 }
 0x349   :  { %289 = vrot.lane.b32.xlu0 %v287_v46, %s677_s11 }
 0x358   :  { %v296_v51 = vpop.permute.xlu1 %295 }
 0x3bb   :  { %v290_v48 = vpop.permute.xlu0 %289 }
 0x3bc   :  { %v292_v49 = vadd.f32 %v290_v48, %v282_v47 }
 0x3be   :  { %536 = vtanh.f32 %v292_v49  ;;  %398 = vst.msk [vmem:[#allocation11] sm:$0x3] %vm383_vm3, %v292_v49 }
 0x3cb   :  { %v537_v50 = vpop.eup %536 }
 0x3cc   :  { %v298_v52 = vmul.f32 %v537_v50, %v296_v51 }
 0x3ce   :  { %508 = vmatmul.mubr.msk.f32.vlgmr.msra.gmra.mxu1 %vm201_vm2, %v298_v52  ;;  %397 = vst.msk [vmem:[#allocation9] sm:$0x3] %vm383_vm3, %v298_v52 }
 0x48e   :  { %v379_v54 = vpop.f32.mrf.mxu1 }
 0x48f   :  { %v380_v55 = vadd.f32 %v448_v53, %v379_v54 }
 0x490   :  { %v509_v56 = vpop.f32.mrf.mxu1 }
 0x491   :  { %v384_v57 = vsel %vm383_vm3, %v380_v55, -inf }
 0x492   :  { %385 = vmax.xlane.f32.xlu0 %v384_v57 }
 0x51b   :  { %v386_v58 = vpop.xlane.xlu0 %385 }
 0x51c   :  { %v387_v59 = vsub.f32 %v380_v55, %v386_v58 }
 0x51e   :  { %v388_v60 = vmul.f32 1.442695, %v387_v59 }
 0x520   :  { %538 = vpow2.f32 %v388_v60 }
 0x52d   :  { %v539_v61 = vpop.eup %538 }
 0x52e   :  { %v390_v62 = vsel %vm383_vm3, %v539_v61, 0.0 }
 0x52f   :  { %391 = vadd.xlane.f32.xlu1 %v390_v62 }
 0x530   :  { %613 = shalt.err (!%p610_p5)
}
 0x531   :  { %418 = dma.vmem_to_hbm [thread:$0]  %s416_s16, 32, %s814_s9, [#allocation10]  }
 0x532   :  { %s680_s19 = smov [#allocation11]  }
 0x533   :  { %s425_s20 = sshll.u32 %s680_s19, 4  ;;  %s426_s20 = int_to_ptr.vmem [resolvable:$true] %s425_s20 }
 0x534   :  { %s622_s21 = scalar_lea.vmem %s426_s20, 32  ;;  %p627_p7 = scmp.lt.s32.totalorder %s426_s20, %s426_s20 }
 0x535   :  { %p623_p6 = scmp.ne.s32.totalorder %s426_s20, %s622_s21  ;;  %p628_p8 = scmp.lt.s32.totalorder %s622_s21, %s622_s21 }
 0x537   :  { %p629_p9 = por %p628_p8, %p627_p7 }
 0x539   :  { %p630_p10 = pnand %p629_p9, %p623_p6 }
 0x53b   :  { %633 = shalt.err (!%p630_p10)
}
 0x53c   :  { %428 = dma.vmem_to_hbm [thread:$0]  %s426_s20, 32, %s815_s10, [#allocation10]  }
 0x53d   :  { %s681_s24 = smov [#allocation8]  }
 0x53e   :  { %s405_s25 = sshll.u32 %s681_s24, 4  ;;  %s406_s25 = int_to_ptr.vmem [resolvable:$true] %s405_s25 }
 0x53f   :  { %s642_s9 = scalar_lea.vmem %s406_s25, 32  ;;  %p647_p12 = scmp.lt.s32.totalorder %s406_s25, %s406_s25 }
 0x540   :  { %p643_p11 = scmp.ne.s32.totalorder %s406_s25, %s642_s9  ;;  %p648_p13 = scmp.lt.s32.totalorder %s642_s9, %s642_s9 }
 0x542   :  { %p649_p0 = por %p648_p13, %p647_p12 }
 0x544   :  { %p650_p1 = pnand %p649_p0, %p643_p11 }
 0x5b8   :  { %v392_v63 = vpop.xlane.xlu1 %391 }
 0x5b9   :  { %540 = vlog2.f32 %v392_v63 }
 0x5c6   :  { %v541_v0 = vpop.eup %540 }
 0x5c7   :  { %v394_v1 = vmul.f32 0.6931472, %v541_v0 }
 0x5c9   :  { %v395_v2 = vsub.f32 %v387_v59, %v394_v1 }
 0x5cb   :  { %396 = vst.msk [vmem:[#allocation8] sm:$0x3] %vm383_vm3, %v395_v2 }
 0x5cc   :  { %653 = shalt.err (!%p650_p1)
}
 0x5cd   :  { %408 = dma.vmem_to_hbm [thread:$0]  %s406_s25, 32, %s813_s8, [#allocation4]  }
 0x5ce   :  { %666 = dma.done.wait [#allocation4], 32  }
 0x5cf   :  { %667 = vsyncadd [#allocation4], 4294967264 }
 0x5d0   :  { %668 = dma.done.wait [#allocation10], 64  }
 0x5d1   :  { %669 = vsyncadd [#allocation10], 4294967232 }
 0x5d2   :  { %438 = vsyncpa [#allocation3], 1 }
 0x5d3   :  { %439 = vsyncpa [#allocation6], 1 }
 0x5d4   :  { %440 = vsyncpa [#allocation4], 1 }
 0x5d5   :  { %441 = vsyncpa [#allocation10], 1 }

</bundles_post_ra>
